<compile_context>
chip_gen: v7x
topology: tpu7x:2x2x1
jax: 0.10.0
libtpu: 0.0.40
codegen_flags: <defaults>
</compile_context>

<pallas_src>
import math

import jax
import jax.numpy as jnp
from jax.experimental import pallas as pl
from jax.experimental.pallas import tpu as pltpu


# Lane widths tried in order (all multiples of 128 -> unmasked vector stores).
_LANE_CHOICES = (4096, 2048, 1024, 512, 256, 128)
# ~4 MiB f32 tile -> ~16 MiB with default double buffering of in + out.
_MAX_TILE_ELEMS = 2048 * 512
# Split into >= 2 blocks once the slab has this many rows, so both v7x
# TensorCores get work (harmless on single-TC v5e/v6e).
_SPLIT_ROWS = 256


def _gelu_tanh_kernel(x_ref, o_ref):
    """Elementwise tanh-approx GELU on one (block_rows, lanes) VMEM tile."""
    x = x_ref[...].astype(jnp.float32)   # f32 compute: correct on v5e too
    c = jnp.float32(math.sqrt(2.0 / math.pi))
    inner = c * (x + jnp.float32(0.044715) * x * x * x)
    y = jnp.float32(0.5) * x * (jnp.float32(1.0) + jnp.tanh(inner))
    o_ref[...] = y.astype(o_ref.dtype)


def lambda_gelu(x):
    """Lambda(F.gelu, approximate='tanh') forward pass via Pallas.

    x: any-shaped float array (the PyTorch example uses NCHW [N, C, H, W]).
    Returns an array of the same shape/dtype.
    """
    orig_shape = x.shape
    orig_dtype = x.dtype
    total = math.prod(orig_shape)
    itemsize = jnp.dtype(orig_dtype).itemsize

    # --- Flatten to a lane-dense 2-D slab [rows, lanes] -------------------
    # Pick the widest lane count that divides the element count so the common
    # case needs no pad and no post-slice (the biggest lever for a mem-bound
    # op). Fall back to a minimal 128-lane pad only when nothing divides.
    lanes = None
    for cand in _LANE_CHOICES:
        if total % cand == 0:
            lanes = cand
            break
    padded_total = total
    if lanes is None:
        lanes = 128
        padded_total = ((total + lanes - 1) // lanes) * lanes

    flat = x.reshape(-1)
    if padded_total != total:
        flat = jnp.pad(flat, (0, padded_total - total))
    rows = padded_total // lanes
    x2d = flat.reshape(rows, lanes)

    # --- Choose the block (tile) shape -------------------------------------
    # Cap the tile at ~_MAX_TILE_ELEMS so the double-buffered footprint stays
    # well under the 32 MiB scoped VMEM budget on all generations (incl. v7x).
    max_block_rows = min(rows, _MAX_TILE_ELEMS // lanes, 2048)
    max_block_rows = max(8, (max_block_rows // 8) * 8)

    if rows <= max_block_rows:
        if rows >= _SPLIT_ROWS:
            # Mid-sized input: split into (at least) 2 blocks so both v7x TCs
            # participate; rounded to a sublane multiple so the (8,128) block
            # divisibility rule holds. Last block may be partial (masked).
            block_rows = ((pl.cdiv(rows, 2) + 7) // 8) * 8
        else:
            # Tiny input: single block covering the whole slab (block shape ==
            # full array dims, so no divisibility constraint applies).
            block_rows = rows
    else:
        # Large input: full-size tiles; partial last block handled by Pallas
        # (no explicit row padding -> no extra HBM pass).
        block_rows = max_block_rows

    grid = (pl.cdiv(rows, block_rows),)
    block = (block_rows, lanes)

    y2d = pl.pallas_call(
        _gelu_tanh_kernel,
        out_shape=jax.ShapeDtypeStruct((rows, lanes), orig_dtype),
        grid=grid,
        in_specs=[pl.BlockSpec(block, lambda i: (i, 0))],
        out_specs=pl.BlockSpec(block, lambda i: (i, 0)),
        compiler_params=pltpu.CompilerParams(
            # Shards blocks across v7x TensorCores; no-op on v5e/v6e.
            # TODO(synk): profile on v7x; switch to pltpu.CORE_PARALLEL if only
            # one TC's DMA path is busy for large inputs.
            dimension_semantics=("parallel",),
            # v5e scoped-VMEM default is 16 MiB; the ~16 MiB double-buffered
            # footprint of the largest tiles needs this override there.
            vmem_limit_bytes=32 * 1024 * 1024,
        ),
        cost_estimate=pl.CostEstimate(
            flops=10 * total,
            transcendentals=total,
            bytes_accessed=2 * total * itemsize,
        ),
    )(x2d)

    if padded_total != total:
        return y2d.reshape(-1)[:total].reshape(orig_shape)
    return y2d.reshape(orig_shape)


def _gelu_tanh_ref(x):
    c = math.sqrt(2.0 / math.pi)
    return 0.5 * x * (1.0 + jnp.tanh(c * (x + 0.044715 * x**3)))


if __name__ == "__main__":
    key = jax.random.PRNGKey(0)
    x = jax.random.normal(key, (2, 4, 16, 16), dtype=jnp.float32)

    y = lambda_gelu(x)
    jax.block_until_ready(y)

    y_ref = _gelu_tanh_ref(x)
    assert y.shape == x.shape and y.dtype == x.dtype
    assert jnp.allclose(y, y_ref, atol=1e-5, rtol=1e-5)

    print("KERNEL_OK")
</pallas_src>

<mosaic_0001>
module attributes {stable_mosaic.version = 11 : i64} {
  func.func @_gelu_tanh_kernel(%arg0: i32, %arg1: memref<1x2048xf32, #tpu.memory_space<vmem>>, %arg2: memref<1x2048xf32, #tpu.memory_space<vmem>>) attributes {dimension_semantics = [#tpu.dimension_semantics<parallel>], iteration_bounds = array<i64: 1>, scalar_prefetch = 0 : i64, scratch_operands = 0 : i64, tpu.core_type = #tpu.core_type<tc>, window_params = [{transform_indices = @transform_0, window_bounds = array<i64: 1, 2048>}, {transform_indices = @transform_1, window_bounds = array<i64: 1, 2048>}]} {
    %c0 = arith.constant 0 : index
    %c0_0 = arith.constant 0 : index
    %0 = vector.load %arg1[%c0, %c0_0] : memref<1x2048xf32, #tpu.memory_space<vmem>>, vector<1x2048xf32>
    %cst = arith.constant 4.471500e-02 : f32
    %1 = vector.broadcast %cst : f32 to vector<1x2048xf32>
    %2 = arith.mulf %1, %0 : vector<1x2048xf32>
    %3 = arith.mulf %2, %0 : vector<1x2048xf32>
    %4 = arith.mulf %3, %0 : vector<1x2048xf32>
    %5 = arith.addf %0, %4 : vector<1x2048xf32>
    %cst_1 = arith.constant 0.797884583 : f32
    %6 = vector.broadcast %cst_1 : f32 to vector<1x2048xf32>
    %7 = arith.mulf %6, %5 : vector<1x2048xf32>
    %cst_2 = arith.constant 5.000000e-01 : f32
    %8 = vector.broadcast %cst_2 : f32 to vector<1x2048xf32>
    %9 = arith.mulf %8, %0 : vector<1x2048xf32>
    %10 = math.tanh %7 : vector<1x2048xf32>
    %cst_3 = arith.constant 1.000000e+00 : f32
    %11 = vector.broadcast %cst_3 : f32 to vector<1x2048xf32>
    %12 = arith.addf %11, %10 : vector<1x2048xf32>
    %13 = arith.mulf %9, %12 : vector<1x2048xf32>
    %c0_4 = arith.constant 0 : index
    %c0_5 = arith.constant 0 : index
    %14 = vector.load %arg2[%c0_4, %c0_5] : memref<1x2048xf32, #tpu.memory_space<vmem>>, vector<1x2048xf32>
    tpu.vector_store %arg2[%c0_4, %c0_5], %13 {strides = array<i32>} : memref<1x2048xf32, #tpu.memory_space<vmem>>, vector<1x2048xf32>,
    return
  }
  func.func @transform_0(%arg0: i32) -> (i32, i32) {
    %c0_i32 = arith.constant 0 : i32
    %c0_i32_0 = arith.constant 0 : i32
    return %arg0, %c0_i32 : i32, i32
  }
  func.func @transform_1(%arg0: i32) -> (i32, i32) {
    %c0_i32 = arith.constant 0 : i32
    %c0_i32_0 = arith.constant 0 : i32
    return %arg0, %c0_i32 : i32, i32
  }
}

</mosaic_0001>

<bundles_post_ra>
// kernel: tpu_custom_call.1
= control target key start
LH: loop header
LB: loop body
LE: loop exit
PB: predicated region body
PF: predicated region fallthrough
CT: control target
= control target key end

     0   :  { %6 = vsyncpa [#allocation3], 0  ;;  %s148_s0 = inlined_call_operand.hbm [shape: f32[1,2048], index: 0, kind: input, shape index: {}]   ;;  %s149_s1 = inlined_call_operand.hbm [shape: f32[1,2048], index: 1, kind: output, shape index: {}]  }
   0x1   :  { %7 = vsyncpa [#allocation4], 0  ;;  %s112_s6 = smov [#allocation2]   ;;  %s64_s10 = scalar_lea.hbm %s148_s0, 256 }
   0x2   :  { %s14_s7 = sshll.u32 %s112_s6, 4  ;;  %p65_p0 = scmp.ne.s32.totalorder %s148_s0, %s64_s10  ;;  %s15_s7 = int_to_ptr.vmem [resolvable:$true] %s14_s7 }
   0x3   :  { %p68_p1 = scmp.lt.u32.totalorder %s64_s10, %s148_s0 }
   0x5   :  { %p70_p2 = pnand %p68_p1, %p65_p0 }
   0x7   :  { %73 = shalt.err (!%p70_p2)
}
   0x8   :  { %s74_s15 = scalar_lea.vmem %s15_s7, 256  ;;  %p79_p4 = scmp.lt.s32.totalorder %s15_s7, %s15_s7 }
   0x9   :  { %p75_p3 = scmp.ne.s32.totalorder %s15_s7, %s74_s15  ;;  %p80_p5 = scmp.lt.s32.totalorder %s74_s15, %s74_s15 }
   0xb   :  { %p81_p6 = por %p80_p5, %p79_p4 }
   0xd   :  { %p82_p7 = pnand %p81_p6, %p75_p3 }
   0xf   :  { %85 = shalt.err (!%p82_p7)
}
  0x10   :  { %17 = dma.hbm_to_vmem [thread:$0]  %s148_s0, 256, %s15_s7, [#allocation3]  }
  0x11   :  { %108 = dma.done.wait [#allocation3], 256  }
  0x12   :  { %109 = vsyncadd [#allocation3], 4294967040  ;;  %v21_v0 = vld [vmem:[#allocation2] sm:$0xff]  ;;  %v22_v1 = vld [vmem:[#allocation2 + $0x8] sm:$0xff]  ;;  %s113_s0 = smov [#allocation5]  }
  0x13   :  { %v23_v2 = vmul.f32 0.044715, %v21_v0  ;;  %v24_v3 = vmul.f32 0.044715, %v22_v1  ;;  %v33_v12 = vmul.f32 0.5, %v21_v0  ;;  %v34_v14 = vmul.f32 0.5, %v22_v1 }
  0x14   :  { %s49_s18 = sshll.u32 %s113_s0, 4  ;;  %s50_s18 = int_to_ptr.vmem [resolvable:$true] %s49_s18 }
  0x15   :  { %v25_v4 = vmul.f32 %v23_v2, %v21_v0  ;;  %v26_v5 = vmul.f32 %v24_v3, %v22_v1  ;;  %s86_s19 = scalar_lea.vmem %s50_s18, 256  ;;  %p91_p9 = scmp.lt.s32.totalorder %s50_s18, %s50_s18 }
  0x16   :  { %p87_p8 = scmp.ne.s32.totalorder %s50_s18, %s86_s19  ;;  %p92_p10 = scmp.lt.s32.totalorder %s86_s19, %s86_s19 }
  0x17   :  { %v27_v6 = vmul.f32 %v25_v4, %v21_v0  ;;  %v28_v7 = vmul.f32 %v26_v5, %v22_v1 }
  0x18   :  { %p93_p11 = por %p92_p10, %p91_p9 }
  0x19   :  { %v29_v8 = vadd.f32 %v27_v6, %v21_v0  ;;  %v30_v9 = vadd.f32 %v28_v7, %v22_v1 }
  0x1a   :  { %p94_p12 = pnand %p93_p11, %p87_p8 }
  0x1b   :  { %v31_v10 = vmul.f32 0.7978846, %v29_v8  ;;  %v32_v11 = vmul.f32 0.7978846, %v30_v9 }
  0x1d   :  { %60 = vtanh.f32 %v31_v10 }
  0x1e   :  { %62 = vtanh.f32 %v32_v11 }
  0x27   :  { %v61_v13 = vpop.eup %60 }
  0x28   :  { %v63_v15 = vpop.eup %62  ;;  %v37_v16 = vadd.f32 1.0, %v61_v13 }
  0x29   :  { %v38_v17 = vadd.f32 1.0, %v63_v15 }
  0x2a   :  { %v39_v18 = vmul.f32 %v37_v16, %v33_v12 }
  0x2b   :  { %v40_v19 = vmul.f32 %v38_v17, %v34_v14 }
  0x2c   :  { %41 = vst [vmem:[#allocation5] sm:$0xff] %v39_v18 }
  0x2d   :  { %42 = vst [vmem:[#allocation5 + $0x8] sm:$0xff] %v40_v19 }
  0x2e   :  { %97 = shalt.err (!%p94_p12)
}
  0x2f   :  { %s98_s22 = scalar_lea.hbm %s149_s1, 256 }
  0x30   :  { %p99_p13 = scmp.ne.s32.totalorder %s149_s1, %s98_s22  ;;  %p102_p0 = scmp.lt.u32.totalorder %s98_s22, %s149_s1 }
  0x32   :  { %p104_p1 = pnand %p102_p0, %p99_p13 }
  0x34   :  { %107 = shalt.err (!%p104_p1)
}
  0x35   :  { %52 = dma.vmem_to_hbm [thread:$0]  %s50_s18, 256, %s149_s1, [#allocation4]  }
  0x36   :  { %110 = dma.done.wait [#allocation4], 256  }
  0x37   :  { %111 = vsyncadd [#allocation4], 4294967040 }
  0x38   :  { %56 = vsyncpa [#allocation3], 1 }
  0x39   :  { %57 = vsyncpa [#allocation4], 1 }

</bundles_post_ra>
